<compile_context>
chip_gen: v7x
topology: tpu7x:2x2x1
jax: 0.10.0
libtpu: 0.0.40
codegen_flags: <defaults>
</compile_context>

<pallas_src>
import math

import jax
import jax.numpy as jnp
from jax.experimental import pallas as pl
from jax.experimental.pallas import tpu as pltpu


# ----------------------------------------------------------------------------
# helpers
# ----------------------------------------------------------------------------
def _round_up(n, m):
    return ((n + m - 1) // m) * m


_SQRT_2_OVER_PI = 0.7978845608028654
_GELU_C = 0.044715


def _gelu_tanh(x):
    """tanh-approx GELU: 0.5*x*(1 + tanh(sqrt(2/pi)*(x + 0.044715*x^3))).

    ~6 VPU ops + 1 EUP tanh per element (the EUP slot is otherwise idle while
    the MXU runs), versus ~20 VPU ops for an erf polynomial.  Max abs
    deviation from exact erf GELU is ~1e-3 -- below bf16-matmul noise."""
    x3 = x * x * x
    return 0.5 * x * (1.0 + jnp.tanh(_SQRT_2_OVER_PI * (x + _GELU_C * x3)))


def _default_act_dtype():
    """bf16 elementwise GELU on chips with a native bf16 VPU/EUP (v6e/v7x);
    f32 elsewhere (v5e and older have no bf16 vector/transcendental path)."""
    try:
        kind = jax.devices()[0].device_kind.lower()
    except Exception:  # pragma: no cover
        return jnp.float32
    if any(tag in kind for tag in ("v6", "v7", "7x")):
        return jnp.bfloat16
    return jnp.float32


# ----------------------------------------------------------------------------
# fused Mlp kernel: fc1 -> GELU -> fc2 -> LeakyReLU
# ----------------------------------------------------------------------------
def _make_mlp_kernel(act_dtype):
    def kernel(x_ref, w1_ref, b1_ref, w2_ref, b2_ref, o_ref):
        # In-kernel bf16 cast of x (cheap VPU op hidden under the MXU) --
        # avoids a wrapper-side cast pass over x in HBM.
        x = x_ref[...].astype(w1_ref.dtype)                        # (TN, Din) bf16
        h = jnp.dot(x, w1_ref[...], preferred_element_type=jnp.float32)
        h = h + b1_ref[...]                                        # f32 bias add
        h = _gelu_tanh(h.astype(act_dtype))                        # bf16 on v6e/v7x
        h = h.astype(w2_ref.dtype)                                 # bf16 for MXU
        y = jnp.dot(h, w2_ref[...], preferred_element_type=jnp.float32)
        y = y + b2_ref[...]                                        # f32
        y = jnp.where(y >= 0.0, y, 0.01 * y)                       # LeakyReLU(0.01)
        o_ref[...] = y.astype(o_ref.dtype)
    return kernel


# ----------------------------------------------------------------------------
# parameter prep (hoisted out of the hot path: transpose + pad + cast ONCE)
# ----------------------------------------------------------------------------
def prepare_params(fc1_w, fc1_b, fc2_w, fc2_b,
                   compute_dtype=jnp.bfloat16, act_dtype=None):
    """fc1_w:(hid,in), fc2_w:(out,hid) in torch nn.Linear layout.

    Zero padding of hidden/out dims to lane multiples of 128 is numerically
    exact: padded hidden units get b1=0, GELU(0)=0 and their W2 rows are zero;
    padded output columns are sliced off by the wrapper."""
    hid, din = fc1_w.shape
    dout, _ = fc2_w.shape
    hid_p = _round_up(hid, 128)
    out_p = _round_up(dout, 128)

    w1 = jnp.zeros((din, hid_p), jnp.float32).at[:, :hid].set(
        fc1_w.T.astype(jnp.float32))
    b1 = jnp.zeros((1, hid_p), jnp.float32).at[0, :hid].set(
        fc1_b.astype(jnp.float32))
    w2 = jnp.zeros((hid_p, out_p), jnp.float32).at[:hid, :dout].set(
        fc2_w.T.astype(jnp.float32))
    b2 = jnp.zeros((1, out_p), jnp.float32).at[0, :dout].set(
        fc2_b.astype(jnp.float32))

    # Resident-weights design guard (see header TODO about hidden-dim tiling).
    weight_bytes = (w1.size + w2.size) * jnp.dtype(compute_dtype).itemsize
    assert weight_bytes < 24 * 1024 * 1024, (
        "resident-weights Mlp kernel needs hidden/out tiling for this size")

    return {
        "w1": w1.astype(compute_dtype),   # (Din, Hp)  bf16, lane-aligned
        "b1": b1,                         # (1, Hp)    f32
        "w2": w2.astype(compute_dtype),   # (Hp, Mp)   bf16, lane-aligned
        "b2": b2,                         # (1, Mp)    f32
        "in_features": din,
        "out_features": dout,
        "compute_dtype": compute_dtype,
        "act_dtype": act_dtype if act_dtype is not None else _default_act_dtype(),
    }


def init_params(key, in_features, hidden_features=None, out_features=None,
                compute_dtype=jnp.bfloat16):
    """torch nn.Linear default init (U(-1/sqrt(fan_in), 1/sqrt(fan_in)))."""
    out_features = out_features or in_features
    hidden_features = hidden_features or in_features
    k1, k2, k3, k4 = jax.random.split(key, 4)

    def uni(k, shape, fan_in):
        b = 1.0 / float(fan_in) ** 0.5
        return jax.random.uniform(k, shape, jnp.float32, -b, b)

    fc1_w = uni(k1, (hidden_features, in_features), in_features)
    fc1_b = uni(k2, (hidden_features,), in_features)
    fc2_w = uni(k3, (out_features, hidden_features), hidden_features)
    fc2_b = uni(k4, (out_features,), hidden_features)

    prepared = prepare_params(fc1_w, fc1_b, fc2_w, fc2_b, compute_dtype)
    raw = {"fc1_w": fc1_w, "fc1_b": fc1_b, "fc2_w": fc2_w, "fc2_b": fc2_b}
    return prepared, raw


# ----------------------------------------------------------------------------
# row-tile selection
# ----------------------------------------------------------------------------
def _pick_row_tile(n_rows):
    """Row-tile size: multiple of 16, as large as practical.

    Measured pipeline efficiency jumps sharply going 256 -> 512 rows/tile
    (per-grid-step overhead ~0.35us), so prefer big tiles from {1024,512,256}
    while minimising padded rows.  Inputs with <= 1024 rows get one exact
    full-extent tile (zero padding, single grid step)."""
    n16 = _round_up(max(n_rows, 1), 16)
    if n16 <= 1024:
        return n16
    best_tn, best_key = None, None
    for tn in (1024, 512, 256):
        waste = _round_up(n16, tn) - n16
        key = (waste, -tn)          # minimise padding, then prefer bigger tile
        if best_key is None or key < best_key:
            best_tn, best_key = tn, key
    return best_tn


# ----------------------------------------------------------------------------
# forward wrapper
# ----------------------------------------------------------------------------
def mlp_forward(params, x, out_dtype=None):
    din = params["in_features"]
    dout = params["out_features"]
    assert x.shape[-1] == din, (x.shape, din)
    lead = x.shape[:-1]
    n = math.prod(lead) if lead else 1
    out_dtype = jnp.dtype(out_dtype) if out_dtype is not None else x.dtype

    # NOTE: no dtype cast here -- x is handed to the kernel as-is (f32) and is
    # cast to bf16 inside the kernel, saving a full HBM pass over the input.
    x2 = x.reshape(n, din)

    tn = _pick_row_tile(n)
    n_pad = _round_up(n, tn)
    if n_pad != n:
        x2 = jnp.zeros((n_pad, din), x2.dtype).at[:n].set(x2)

    hid_p = params["w1"].shape[1]
    out_p = params["w2"].shape[1]

    kernel = _make_mlp_kernel(params["act_dtype"])

    out = pl.pallas_call(
        kernel,
        out_shape=jax.ShapeDtypeStruct((n_pad, out_p), out_dtype),
        grid=(n_pad // tn,),
        in_specs=[
            pl.BlockSpec((tn, din), lambda i: (i, 0)),        # x rows tiled
            pl.BlockSpec((din, hid_p), lambda i: (0, 0)),     # W1 resident
            pl.BlockSpec((1, hid_p), lambda i: (0, 0)),       # b1 resident
            pl.BlockSpec((hid_p, out_p), lambda i: (0, 0)),   # W2 resident
            pl.BlockSpec((1, out_p), lambda i: (0, 0)),       # b2 resident
        ],
        out_specs=pl.BlockSpec((tn, out_p), lambda i: (i, 0)),  # lane-dense
        compiler_params=pltpu.CompilerParams(
            dimension_semantics=("parallel",),
            vmem_limit_bytes=32 * 1024 * 1024,
        ),
    )(x2, params["w1"], params["b1"], params["w2"], params["b2"])

    # Slice off padded rows / lane-padding columns.  Callers able to consume
    # the lane-padded (n_pad, out_p) slab directly may skip this extra pass.
    return out[:n, :dout].reshape(*lead, dout)


# ----------------------------------------------------------------------------
# pure-JAX reference (bf16 MXU operands like the kernel, exact-erf f32 GELU)
# ----------------------------------------------------------------------------
def mlp_reference(params, raw, x):
    cd = params["compute_dtype"]
    lead = x.shape[:-1]
    xb = x.reshape(-1, raw["fc1_w"].shape[1]).astype(cd)
    w1 = raw["fc1_w"].T.astype(cd)
    w2 = raw["fc2_w"].T.astype(cd)
    h = jnp.dot(xb, w1, preferred_element_type=jnp.float32) + raw["fc1_b"]
    h = jax.nn.gelu(h, approximate=False)      # exact erf GELU (nn.GELU())
    h = h.astype(cd)
    y = jnp.dot(h, w2, preferred_element_type=jnp.float32) + raw["fc2_b"]
    y = jnp.where(y >= 0.0, y, 0.01 * y)
    return y.reshape(*lead, raw["fc2_w"].shape[0])


# ----------------------------------------------------------------------------
if __name__ == "__main__":
    # Shapes consistent with how the module is used in My_DFANet (mlp1 path):
    # in_features = 4*9*9 = 324, hidden = 324, out_features = 1*9*9 = 81.
    B = 2
    IN_F = 4 * 9 * 9
    HID_F = IN_F
    OUT_F = 1 * 9 * 9

    key = jax.random.PRNGKey(0)
    kx, kx3, kp = jax.random.split(key, 3)
    x = jax.random.normal(kx, (B, IN_F), dtype=jnp.float32)

    params, raw = init_params(kp, IN_F, HID_F, OUT_F)

    out = jax.block_until_ready(mlp_forward(params, x))
    assert out.shape == (B, OUT_F), out.shape
    assert out.dtype == x.dtype, out.dtype
    assert bool(jnp.all(jnp.isfinite(out)))

    ref = mlp_reference(params, raw, x)
    max_err = float(jnp.max(jnp.abs(out - ref)))
    # Error budget vs exact-erf f32-GELU reference: tanh-approx GELU (~1e-3),
    # bf16 elementwise GELU on v6e/v7x, bf16 MXU operands in both paths.
    assert max_err < 3e-2, max_err

    # 3-D input exercising the leading-dim flatten + row-padding path.
    x3 = jax.random.normal(kx3, (2, 8, IN_F), dtype=jnp.float32)
    out3 = jax.block_until_ready(mlp_forward(params, x3))
    assert out3.shape == (2, 8, OUT_F), out3.shape
    ref3 = mlp_reference(params, raw, x3)
    assert float(jnp.max(jnp.abs(out3 - ref3))) < 3e-2

    print("KERNEL_OK")
</pallas_src>

<mosaic_0001>
module attributes {stable_mosaic.version = 11 : i64} {
  func.func @kernel(%arg0: i32, %arg1: memref<16x324xf32, #tpu.memory_space<vmem>>, %arg2: memref<324x384xbf16, #tpu.memory_space<vmem>>, %arg3: memref<1x384xf32, #tpu.memory_space<vmem>>, %arg4: memref<384x128xbf16, #tpu.memory_space<vmem>>, %arg5: memref<1x128xf32, #tpu.memory_space<vmem>>, %arg6: memref<16x128xf32, #tpu.memory_space<vmem>>) attributes {dimension_semantics = [#tpu.dimension_semantics<parallel>], iteration_bounds = array<i64: 1>, scalar_prefetch = 0 : i64, scratch_operands = 0 : i64, tpu.core_type = #tpu.core_type<tc>, window_params = [{transform_indices = @transform_0, window_bounds = array<i64: 16, 324>}, {pipeline_mode = #tpu.pipeline_mode<synchronous>, transform_indices = @transform_1, window_bounds = array<i64: 324, 384>}, {pipeline_mode = #tpu.pipeline_mode<synchronous>, transform_indices = @transform_2, window_bounds = array<i64: 1, 384>}, {pipeline_mode = #tpu.pipeline_mode<synchronous>, transform_indices = @transform_3, window_bounds = array<i64: 384, 128>}, {pipeline_mode = #tpu.pipeline_mode<synchronous>, transform_indices = @transform_4, window_bounds = array<i64: 1, 128>}, {transform_indices = @transform_5, window_bounds = array<i64: 16, 128>}]} {
    %c0 = arith.constant 0 : index
    %c0_0 = arith.constant 0 : index
    %0 = vector.load %arg1[%c0, %c0_0] : memref<16x324xf32, #tpu.memory_space<vmem>>, vector<16x324xf32>
    %1 = arith.truncf %0 : vector<16x324xf32> to vector<16x324xbf16>
    %c0_1 = arith.constant 0 : index
    %c0_2 = arith.constant 0 : index
    %2 = vector.load %arg2[%c0_1, %c0_2] : memref<324x384xbf16, #tpu.memory_space<vmem>>, vector<324x384xbf16>
    %cst = arith.constant dense<0.000000e+00> : vector<16x384xf32>
    %3 = tpu.matmul %1, %2, %cst {dimension_numbers = #tpu.dot_dimension_numbers<[1], [0], [0], [1], [0, 0, 1, 1], [], []>} : vector<16x324xbf16>, vector<324x384xbf16>, vector<16x384xf32> -> vector<16x384xf32>
    %c0_3 = arith.constant 0 : index
    %c0_4 = arith.constant 0 : index
    %4 = vector.load %arg3[%c0_3, %c0_4] : memref<1x384xf32, #tpu.memory_space<vmem>>, vector<1x384xf32>
    %5 = vector.broadcast %4 : vector<1x384xf32> to vector<16x384xf32>
    %6 = arith.addf %3, %5 : vector<16x384xf32>
    %7 = arith.mulf %6, %6 : vector<16x384xf32>
    %8 = arith.mulf %7, %6 : vector<16x384xf32>
    %cst_5 = arith.constant 5.000000e-01 : f32
    %9 = vector.broadcast %cst_5 : f32 to vector<16x384xf32>
    %10 = arith.mulf %9, %6 : vector<16x384xf32>
    %cst_6 = arith.constant 4.471500e-02 : f32
    %11 = vector.broadcast %cst_6 : f32 to vector<16x384xf32>
    %12 = arith.mulf %11, %8 : vector<16x384xf32>
    %13 = arith.addf %6, %12 : vector<16x384xf32>
    %cst_7 = arith.constant 0.797884583 : f32
    %14 = vector.broadcast %cst_7 : f32 to vector<16x384xf32>
    %15 = arith.mulf %14, %13 : vector<16x384xf32>
    %16 = math.tanh %15 : vector<16x384xf32>
    %cst_8 = arith.constant 1.000000e+00 : f32
    %17 = vector.broadcast %cst_8 : f32 to vector<16x384xf32>
    %18 = arith.addf %17, %16 : vector<16x384xf32>
    %19 = arith.mulf %10, %18 : vector<16x384xf32>
    %20 = arith.truncf %19 : vector<16x384xf32> to vector<16x384xbf16>
    %c0_9 = arith.constant 0 : index
    %c0_10 = arith.constant 0 : index
    %21 = vector.load %arg4[%c0_9, %c0_10] : memref<384x128xbf16, #tpu.memory_space<vmem>>, vector<384x128xbf16>
    %cst_11 = arith.constant dense<0.000000e+00> : vector<16x128xf32>
    %22 = tpu.matmul %20, %21, %cst_11 {dimension_numbers = #tpu.dot_dimension_numbers<[1], [0], [0], [1], [0, 0, 1, 1], [], []>} : vector<16x384xbf16>, vector<384x128xbf16>, vector<16x128xf32> -> vector<16x128xf32>
    %c0_12 = arith.constant 0 : index
    %c0_13 = arith.constant 0 : index
    %23 = vector.load %arg5[%c0_12, %c0_13] : memref<1x128xf32, #tpu.memory_space<vmem>>, vector<1x128xf32>
    %24 = vector.broadcast %23 : vector<1x128xf32> to vector<16x128xf32>
    %25 = arith.addf %22, %24 : vector<16x128xf32>
    %cst_14 = arith.constant 0.000000e+00 : f32
    %26 = vector.broadcast %cst_14 : f32 to vector<16x128xf32>
    %27 = arith.cmpf oge, %25, %26 : vector<16x128xf32>
    %cst_15 = arith.constant 0.00999999977 : f32
    %28 = vector.broadcast %cst_15 : f32 to vector<16x128xf32>
    %29 = arith.mulf %28, %25 : vector<16x128xf32>
    %30 = arith.select %27, %25, %29 : vector<16x128xi1>, vector<16x128xf32>
    %c0_16 = arith.constant 0 : index
    %c0_17 = arith.constant 0 : index
    %31 = vector.load %arg6[%c0_16, %c0_17] : memref<16x128xf32, #tpu.memory_space<vmem>>, vector<16x128xf32>
    tpu.vector_store %arg6[%c0_16, %c0_17], %30 {strides = array<i32>} : memref<16x128xf32, #tpu.memory_space<vmem>>, vector<16x128xf32>,
    return
  }
  func.func @transform_0(%arg0: i32) -> (i32, i32) {
    %c0_i32 = arith.constant 0 : i32
    %c0_i32_0 = arith.constant 0 : i32
    return %arg0, %c0_i32 : i32, i32
  }
  func.func @transform_1(%arg0: i32) -> (i32, i32) {
    %c0_i32 = arith.constant 0 : i32
    %c0_i32_0 = arith.constant 0 : i32
    %c0_i32_1 = arith.constant 0 : i32
    return %c0_i32, %c0_i32_0 : i32, i32
  }
  func.func @transform_2(%arg0: i32) -> (i32, i32) {
    %c0_i32 = arith.constant 0 : i32
    %c0_i32_0 = arith.constant 0 : i32
    %c0_i32_1 = arith.constant 0 : i32
    return %c0_i32, %c0_i32_0 : i32, i32
  }
  func.func @transform_3(%arg0: i32) -> (i32, i32) {
    %c0_i32 = arith.constant 0 : i32
    %c0_i32_0 = arith.constant 0 : i32
    %c0_i32_1 = arith.constant 0 : i32
    return %c0_i32, %c0_i32_0 : i32, i32
  }
  func.func @transform_4(%arg0: i32) -> (i32, i32) {
    %c0_i32 = arith.constant 0 : i32
    %c0_i32_0 = arith.constant 0 : i32
    %c0_i32_1 = arith.constant 0 : i32
    return %c0_i32, %c0_i32_0 : i32, i32
  }
  func.func @transform_5(%arg0: i32) -> (i32, i32) {
    %c0_i32 = arith.constant 0 : i32
    %c0_i32_0 = arith.constant 0 : i32
    return %arg0, %c0_i32 : i32, i32
  }
}

</mosaic_0001>

<bundles_post_ra>
// kernel: tpu_custom_call.1
= control target key start
LH: loop header
LB: loop body
LE: loop exit
PB: predicated region body
PF: predicated region fallthrough
CT: control target
= control target key end

     0   :  { %10 = vsyncpa [#allocation3], 0  ;;  %s1588_s0 = inlined_call_operand.hbm [shape: f32[16,324], index: 0, kind: input, shape index: {}]   ;;  %s1589_s1 = inlined_call_operand.hbm [shape: bf16[324,384], index: 1, kind: input, shape index: {}]   ;;  %s1590_s2 = inlined_call_operand.vmem [shape: f32[1,384], index: 2, kind: input, shape index: {}]   ;;  %s1591_s3 = inlined_call_operand.hbm [shape: bf16[384,128], index: 3, kind: input, shape index: {}]   ;;  %s1592_s4 = inlined_call_operand.vmem [shape: f32[1,128], index: 4, kind: input, shape index: {}]   ;;  %s1593_s5 = inlined_call_operand.hbm [shape: f32[16,128], index: 5, kind: output, shape index: {}]  }
   0x1   :  { %11 = vsyncpa [#allocation6], 0 }
   0x2   :  { %12 = vsyncpa [#allocation4], 0  ;;  %s1465_s18 = smov [#allocation5]   ;;  %s1371_s22 = scalar_lea.hbm %s1589_s1, 7872 }
   0x3   :  { %s30_s19 = sshll.u32 %s1465_s18, 4  ;;  %p1372_p0 = scmp.ne.s32.totalorder %s1589_s1, %s1371_s22  ;;  %s31_s19 = int_to_ptr.vmem [resolvable:$true] %s30_s19 }
   0x4   :  { %p1375_p1 = scmp.lt.u32.totalorder %s1371_s22, %s1589_s1 }
   0x6   :  { %p1377_p2 = pnand %p1375_p1, %p1372_p0 }
   0x8   :  { %1380 = shalt.err (!%p1377_p2)
}
   0x9   :  { %s1381_s27 = scalar_lea.vmem %s31_s19, 7872  ;;  %p1386_p4 = scmp.lt.s32.totalorder %s31_s19, %s31_s19 }
   0xa   :  { %p1382_p3 = scmp.ne.s32.totalorder %s31_s19, %s1381_s27  ;;  %p1387_p5 = scmp.lt.s32.totalorder %s1381_s27, %s1381_s27 }
   0xc   :  { %p1388_p6 = por %p1387_p5, %p1386_p4 }
   0xe   :  { %p1389_p7 = pnand %p1388_p6, %p1382_p3 }
  0x10   :  { %1392 = shalt.err (!%p1389_p7)
}
  0x11   :  { %s1466_s28 = smov 192   ;;  %s1467_s29 = smov 12  }
  0x12   :  { %36 = dma.hbm_to_vmem [thread:$0]  %s1589_s1, 7872, %s31_s19, [#allocation6], %s1466_s28, %s1466_s28, %s1467_s29  }
  0x13   :  { %s1468_s7 = smov [#allocation2]   ;;  %s1393_s11 = scalar_lea.hbm %s1588_s0, 768 }
  0x14   :  { %s18_s8 = sshll.u32 %s1468_s7, 4  ;;  %p1394_p8 = scmp.ne.s32.totalorder %s1588_s0, %s1393_s11  ;;  %s19_s8 = int_to_ptr.vmem [resolvable:$true] %s18_s8 }
  0x15   :  { %p1397_p9 = scmp.lt.u32.totalorder %s1393_s11, %s1588_s0 }
  0x17   :  { %p1399_p10 = pnand %p1397_p9, %p1394_p8 }
  0x19   :  { %1402 = shalt.err (!%p1399_p10)
}
  0x1a   :  { %s1403_s16 = scalar_lea.vmem %s19_s8, 768  ;;  %p1408_p12 = scmp.lt.s32.totalorder %s19_s8, %s19_s8 }
  0x1b   :  { %p1404_p11 = scmp.ne.s32.totalorder %s19_s8, %s1403_s16  ;;  %p1409_p13 = scmp.lt.s32.totalorder %s1403_s16, %s1403_s16 }
  0x1d   :  { %p1410_p0 = por %p1409_p13, %p1408_p12 }
  0x1f   :  { %p1411_p1 = pnand %p1410_p0, %p1404_p11 }
  0x21   :  { %1414 = shalt.err (!%p1411_p1)
}
  0x22   :  { %s1469_s1 = smov 384   ;;  %s1470_s17 = smov 24  }
  0x23   :  { %24 = dma.hbm_to_vmem [thread:$0]  %s1588_s0, 768, %s19_s8, [#allocation3], %s1469_s1, %s1469_s1, %s1470_s17  }
  0x24   :  { %s1471_s20 = smov [#allocation7]   ;;  %s1415_s24 = scalar_lea.hbm %s1591_s3, 3072 }
  0x25   :  { %s44_s21 = sshll.u32 %s1471_s20, 4  ;;  %p1416_p2 = scmp.ne.s32.totalorder %s1591_s3, %s1415_s24  ;;  %s45_s21 = int_to_ptr.vmem [resolvable:$true] %s44_s21 }
  0x26   :  { %p1419_p3 = scmp.lt.u32.totalorder %s1415_s24, %s1591_s3 }
  0x28   :  { %p1421_p4 = pnand %p1419_p3, %p1416_p2 }
  0x2a   :  { %1424 = shalt.err (!%p1421_p4)
}
  0x2b   :  { %s1425_s29 = scalar_lea.vmem %s45_s21, 3072  ;;  %p1430_p6 = scmp.lt.s32.totalorder %s45_s21, %s45_s21 }
  0x2c   :  { %p1426_p5 = scmp.ne.s32.totalorder %s45_s21, %s1425_s29  ;;  %p1431_p7 = scmp.lt.s32.totalorder %s1425_s29, %s1425_s29 }
  0x2e   :  { %p1432_p8 = por %p1431_p7, %p1430_p6 }
  0x30   :  { %p1433_p9 = pnand %p1432_p8, %p1426_p5 }
  0x32   :  { %1436 = shalt.err (!%p1433_p9)
}
  0x33   :  { %s1472_s0 = smov 64   ;;  %s1473_s30 = smov 4  }
  0x34   :  { %50 = dma.hbm_to_vmem [thread:$0]  %s1591_s3, 3072, %s45_s21, [#allocation6], %s1472_s0, %s1472_s0, %s1473_s30  }
  0x35   :  { %1459 = dma.done.wait [#allocation3], 768  }
  0x36   :  { %1460 = vsyncadd [#allocation3], 4294966528 }
  0x37   :  { %1461 = dma.done.wait [#allocation6], 10944  }
  0x38   :  { %1462 = vsyncadd [#allocation6], 4294956352  ;;  %v1474_v0 = vmov 0   ;;  %v1252_v1 = vld [vmem:[#allocation5 + $0x4] ss:$12 sps:$4 sm:$0xff]   ;;  %vm503_vm0 = vcmask 1041408  }
  0x39   :  { %588 = vmatprep.mubr.bf16.mxu1 %v1474_v0  ;;  %v1254_v2 = vld [vmem:[#allocation5 + $0x184] ss:$12 sps:$4 sm:$0xff]   ;;  %513 = vmatprep.subr.bf16.mxu0 %v1252_v1  ;;  %v1256_v3 = vld [vmem:[#allocation5] ss:$12 sps:$4 sm:$0xff]   ;;  %v1258_v5 = vld [vmem:[#allocation5 + $0x1c] ss:$12 sps:$4 sm:$0xff]  }
  0x3a   :  { %v1257_v4 = vld [vmem:[#allocation5 + $0x180] ss:$12 sps:$4 sm:$0xff]   ;;  %556 = vmatprep.subr.bf16.mxu1 %v1254_v2  ;;  %514 = vmatpush1.bf16.msra.mxu0 %v1256_v3  ;;  %v1260_v6 = vld [vmem:[#allocation5 + $0x19c] ss:$12 sps:$4 sm:$0xff]   ;;  %v1262_v7 = vld [vmem:[#allocation5 + $0x18] ss:$12 sps:$4 sm:$0xff]  }
  0x3b   :  { %557 = vmatpush1.bf16.msra.mxu1 %v1257_v4  ;;  %515 = vmatprep.subr.bf16.mxu0 %v1258_v5  ;;  %v1263_v8 = vld [vmem:[#allocation5 + $0x198] ss:$12 sps:$4 sm:$0xff]   ;;  %v1264_v9 = vld [vmem:[#allocation5 + $0x34] ss:$12 sps:$4 sm:$0xff]   ;;  %v1268_v11 = vld [vmem:[#allocation5 + $0x30] ss:$12 sps:$4 sm:$0xff]  }
  0x3c   :  { %558 = vmatprep.subr.bf16.mxu1 %v1260_v6  ;;  %v1266_v10 = vld [vmem:[#allocation5 + $0x1b4] ss:$12 sps:$4 sm:$0xff]   ;;  %v1269_v12 = vld [vmem:[#allocation5 + $0x1b0] ss:$12 sps:$4 sm:$0xff]   ;;  %v1270_v13 = vld [vmem:[#allocation5 + $0x4c] ss:$12 sps:$4 sm:$0xff]  }
  0x3d   :  { %v1272_v14 = vld [vmem:[#allocation5 + $0x1cc] ss:$12 sps:$4 sm:$0xff]   ;;  %v1274_v15 = vld [vmem:[#allocation5 + $0x48] ss:$12 sps:$4 sm:$0xff]   ;;  %v152_v16 = vld [vmem:[#allocation5 + $0x1e0] sm:$0x33] }
  0x3e   :  { %516 = vmatpush1.bf16.msra.mxu0 %v1262_v7  ;;  %v1275_v17 = vld [vmem:[#allocation5 + $0x1c8] ss:$12 sps:$4 sm:$0xff]   ;;  %v1105_v18 = vcombine.low %v152_v16, %v152_v16  ;;  %v1276_v19 = vld [vmem:[#allocation5 + $0x64] ss:$12 sps:$4 sm:$0xff]   ;;  %v1106_v20 = vcombine.high %v152_v16, %v152_v16  ;;  %v1279_v21 = vld [vmem:[#allocation5 + $0x60] ss:$12 sps:$4 sm:$0xff]  }
  0x3f   :  { %559 = vmatpush1.bf16.msra.mxu1 %v1263_v8  ;;  %517 = vmatprep.subr.bf16.mxu0 %v1264_v9  ;;  %v1281_v22 = vld [vmem:[#allocation5 + $0x7c] ss:$12 sps:$4 sm:$0xff]   ;;  %v65_v23 = vld [vmem:[#allocation2 + $0x10] sm:$0xff]  ;;  %vm499_vm1 = vcmask 556032   ;;  %v1291_v34 = vld [vmem:[#allocation5 + $0xac] ss:$12 sps:$4 sm:$0xff]  }
  0x40   :  { %560 = vmatprep.subr.bf16.mxu1 %v1266_v10  ;;  %v505_v24 = vsel %vm503_vm0, %v1105_v18, 0  ;;  %v68_v25 = vld [vmem:[#allocation2 + $0x28] sm:$0xff]  ;;  %v1283_v26 = vld [vmem:[#allocation5 + $0xc8] ss:$12 sps:$4 sm:$0xff]   ;;  %v1288_v31 = vld [vmem:[#allocation5 + $0xe0] ss:$12 sps:$4 sm:$0xff]  }
  0x41   :  { %v1548_v27 = vpack.c.bf16 %v68_v25, %v65_v23  ;;  %v1284_v28 = vld [vmem:[#allocation5 + $0x78] ss:$12 sps:$4 sm:$0xff]   ;;  %v1285_v29 = vld [vmem:[#allocation5 + $0x8] ss:$12 sps:$4 sm:$0xff]   ;;  %v1289_v32 = vld [vmem:[#allocation5 + $0x90] ss:$12 sps:$4 sm:$0xff]  }
  0x42   :  { %518 = vmatpush1.bf16.msra.mxu0 %v1268_v11  ;;  %v1286_v30 = vld [vmem:[#allocation5 + $0x94] ss:$12 sps:$4 sm:$0xff]   ;;  %v1293_v35 = vld [vmem:[#allocation5 + $0xf8] ss:$12 sps:$4 sm:$0xff]   ;;  %v1298_v39 = vld [vmem:[#allocation5 + $0x110] ss:$12 sps:$4 sm:$0xff]  }
  0x43   :  { %561 = vmatpush1.bf16.msra.mxu1 %v1269_v12  ;;  %519 = vmatprep.subr.bf16.mxu0 %v1270_v13  ;;  %v1290_v33 = vld [vmem:[#allocation5 + $0x20] ss:$12 sps:$4 sm:$0xff]   ;;  %v1294_v36 = vld [vmem:[#allocation5 + $0xa8] ss:$12 sps:$4 sm:$0xff]   ;;  %v1295_v37 = vld [vmem:[#allocation5 + $0x38] ss:$12 sps:$4 sm:$0xff]  }
  0x44   :  { %562 = vmatprep.subr.bf16.mxu1 %v1272_v14  ;;  %v1296_v38 = vld [vmem:[#allocation5 + $0xc4] ss:$12 sps:$4 sm:$0xff]   ;;  %v1299_v40 = vld [vmem:[#allocation5 + $0xc0] ss:$12 sps:$4 sm:$0xff]   ;;  %v1301_v42 = vld [vmem:[#allocation5 + $0xdc] ss:$12 sps:$4 sm:$0xff]  }
  0x45   :  { %v1300_v41 = vld [vmem:[#allocation5 + $0x50] ss:$12 sps:$4 sm:$0xff]   ;;  %v1303_v43 = vld [vmem:[#allocation5 + $0x128] ss:$12 sps:$4 sm:$0xff]   ;;  %v1304_v44 = vld [vmem:[#allocation5 + $0xd8] ss:$12 sps:$4 sm:$0xff]  }
  0x46   :  { %520 = vmatpush1.bf16.msra.mxu0 %v1274_v15  ;;  %v1305_v45 = vld [vmem:[#allocation5 + $0x68] ss:$12 sps:$4 sm:$0xff]   ;;  %v1308_v47 = vld [vmem:[#allocation5 + $0x140] ss:$12 sps:$4 sm:$0xff]   ;;  %v1309_v48 = vld [vmem:[#allocation5 + $0xf0] ss:$12 sps:$4 sm:$0xff]  }
  0x47   :  { %563 = vmatpush1.bf16.msra.mxu1 %v1275_v17  ;;  %521 = vmatprep.subr.bf16.mxu0 %v1276_v19  ;;  %v1306_v46 = vld [vmem:[#allocation5 + $0xf4] ss:$12 sps:$4 sm:$0xff]   ;;  %v64_v50 = vld [vmem:[#allocation2 + $0x8] sm:$0xff]  ;;  %v1316_v57 = vld [vmem:[#allocation5 + $0x124] ss:$12 sps:$4 sm:$0xff]   ;;  %v1475_v4 = vmov 0.0  }
  0x48   :  { %1108 = vmatprep.subr.msk.bf16.mxu1 %vm503_vm0, %v1106_v20  ;;  %v1310_v49 = vld [vmem:[#allocation5 + $0x80] ss:$12 sps:$4 sm:$0xff]   ;;  %v67_v51 = vld [vmem:[#allocation2 + $0x20] sm:$0xff]  ;;  %v1313_v53 = vld [vmem:[#allocation5 + $0x158] ss:$12 sps:$4 sm:$0xff]   ;;  %vm1476_vm2 = vmmov 0  }
  0x49   :  { %v1311_v52 = vld [vmem:[#allocation5 + $0x10c] ss:$12 sps:$4 sm:$0xff]   ;;  %v70_v54 = vpack.c.bf16 %v67_v51, %v64_v50  ;;  %v1314_v55 = vld [vmem:[#allocation5 + $0x108] ss:$12 sps:$4 sm:$0xff]   ;;  %v1318_v58 = vld [vmem:[#allocation5 + $0x170] ss:$12 sps:$4 sm:$0xff]  }
  0x4a   :  { %522 = vmatpush1.bf16.msra.mxu0 %v1279_v21  ;;  %v1315_v56 = vld [vmem:[#allocation5 + $0x98] ss:$12 sps:$4 sm:$0xff]   ;;  %v1319_v59 = vld [vmem:[#allocation5 + $0x120] ss:$12 sps:$4 sm:$0xff]   ;;  %v1320_v60 = vld [vmem:[#allocation5 + $0xb0] ss:$12 sps:$4 sm:$0xff]  }
  0x4b   :  { %565 = vmatpush1.bf16.msra.mxu1 %v505_v24  ;;  %523 = vmatprep.subr.bf16.mxu0 %v1281_v22  ;;  %v63_v61 = vld [vmem:[#allocation2] sm:$0xff]  ;;  %v66_v62 = vld [vmem:[#allocation2 + $0x18] sm:$0xff]  ;;  %v1323_v0 = vld [vmem:[#allocation5 + $0x138] ss:$12 sps:$4 sm:$0xff]   ;;  %s1477_s10 = smov [#allocation8]  }
  0x4c   :  { %1136 = vmatprep.subr.bf16.mxu1 %v1283_v26  ;;  %545 = vmatprep.mubr.bf16.mxu0 %v70_v54  ;;  %v1321_v63 = vld [vmem:[#allocation5 + $0x13c] ss:$12 sps:$4 sm:$0xff]   ;;  %v69_v2 = vpack.c.bf16 %v66_v62, %v63_v61  ;;  %v1325_v3 = vld [vmem:[#allocation5 + $0x154] ss:$12 sps:$4 sm:$0xff]   ;;  %v1329_v7 = vld [vmem:[#allocation5 + $0x16c] ss:$12 sps:$4 sm:$0xff]  }
  0x4d   :  { %v1324_v1 = vld [vmem:[#allocation5 + $0x188] ss:$12 sps:$4 sm:$0xff]   ;;  %v1327_v5 = vld [vmem:[#allocation5 + $0x150] ss:$12 sps:$4 sm:$0xff]   ;;  %v1328_v6 = vld [vmem:[#allocation5 + $0x1a0] ss:$12 sps:$4 sm:$0xff]  }
  0x4e   :  { %1109 = vmatmul.mubr.msk.bf16.vlgmr.msra.gmra.mrb[0].mxu1 %vm499_vm1, %v1548_v27  ;;  %524 = vmatpush1.bf16.msra.mxu0 %v1284_v28  ;;  %v1331_v8 = vld [vmem:[#allocation5 + $0x168] ss:$12 sps:$4 sm:$0xff]   ;;  %v1332_v9 = vld [vmem:[#allocation5 + $0x1b8] ss:$12 sps:$4 sm:$0xff]   ;;  %v1333_v10 = vld [vmem:[#allocation5 + $0x1d0] ss:$12 sps:$4 sm:$0xff]  }
  0x4f   :  { %1137 = vmatpush3.bf16.msra.mxu1 %v1285_v29  ;;  %525 = vmatprep.subr.bf16.mxu0 %v1286_v30  ;;  %v1334_v11 = vld [vmem:[#allocation5 + $0x1e8] ss:$0 sps:$4 sm:$0x33]   ;;  %v1335_v13 = vld [vmem:[#allocation7 + $0x40] sm:$0xff]   ;;  %v1337_v15 = vld [vmem:[#allocation7 + $0x48] sm:$0xff]   ;;  %s1032_s11 = sshll.u32 %s1477_s10, 4  ;;  %s1033_s11 = int_to_ptr.vmem [resolvable:$true] %s1032_s11 }
  0x50   :  { %1138 = vmatprep.subr.bf16.mxu1 %v1288_v31  ;;  %631 = vmatprep.mubr.bf16.mxu1 %v70_v54  ;;  %v511_v12 = vsel %vm503_vm0, %v1334_v11, 0  ;;  %v1336_v14 = vld [vmem:[#allocation7] sm:$0xff]   ;;  %v1338_v16 = vld [vmem:[#allocation7 + $0x8] sm:$0xff]   ;;  %v1340_v18 = vld [vmem:[#allocation7 + $0x50] sm:$0xff]   ;;  %p1442_p11 = scmp.lt.s32.totalorder %s1033_s11, %s1033_s11 }
  0x51   :  { %v1339_v17 = vld [vmem:[#allocation7 + $0x80] sm:$0xff]   ;;  %v1341_v19 = vld [vmem:[#allocation7 + $0x10] sm:$0xff]   ;;  %v1342_v20 = vld [vmem:[#allocation7 + $0x88] sm:$0xff]  }
  0x52   :  { %526 = vmatpush1.bf16.msra.mxu0 %v1289_v32  ;;  %v1343_v21 = vld [vmem:[#allocation7 + $0x58] sm:$0xff]   ;;  %v1345_v23 = vld [vmem:[#allocation7 + $0x90] sm:$0xff]   ;;  %v1346_v24 = vld [vmem:[#allocation7 + $0x60] sm:$0xff]  }
  0x53   :  { %1139 = vmatpush3.bf16.msra.mxu1 %v1290_v33  ;;  %527 = vmatprep.subr.bf16.mxu0 %v1291_v34  ;;  %v1344_v22 = vld [vmem:[#allocation7 + $0x18] sm:$0xff]   ;;  %v1347_v25 = vld [vmem:[#allocation7 + $0x20] sm:$0xff]   ;;  %v1350_v28 = vld [vmem:[#allocation7 + $0x28] sm:$0xff]  }
  0x54   :  { %1140 = vmatprep.subr.bf16.mxu1 %v1293_v35  ;;  %v1348_v26 = vld [vmem:[#allocation7 + $0x98] sm:$0xff]   ;;  %v1351_v29 = vld [vmem:[#allocation7 + $0xa0] sm:$0xff]   ;;  %v1352_v30 = vld [vmem:[#allocation7 + $0x70] sm:$0xff]  }
  0x55   :  { %v1353_v31 = vld [vmem:[#allocation7 + $0x30] sm:$0xff]   ;;  %v1354_v32 = vld [vmem:[#allocation7 + $0xa8] sm:$0xff]   ;;  %v1355_v33 = vld [vmem:[#allocation7 + $0x78] sm:$0xff]  }
  0x56   :  { %528 = vmatpush1.bf16.msra.mxu0 %v1294_v36  ;;  %v1356_v34 = vld [vmem:[#allocation7 + $0x38] sm:$0xff]   ;;  %v1357_v35 = vld [vmem:[#allocation7 + $0xb0] sm:$0xff]   ;;  %v154_v51 = vld [vmem:[%s1590_s2] sm:$0x7] }
  0x57   :  { %1141 = vmatpush3.bf16.msra.mxu1 %v1295_v37  ;;  %529 = vmatprep.subr.bf16.mxu0 %v1296_v38  ;;  %v1358_v36 = vld [vmem:[#allocation7 + $0xb8] sm:$0xff]  }
  0x58   :  { %1142 = vmatprep.subr.bf16.mxu1 %v1298_v39 }
  0x5a   :  { %530 = vmatpush1.bf16.msra.mxu0 %v1299_v40 }
  0x5b   :  { %1143 = vmatpush3.bf16.msra.mxu1 %v1300_v41  ;;  %531 = vmatprep.subr.bf16.mxu0 %v1301_v42  ;;  %v156_v41 = vlaneseq }
  0x5c   :  { %1144 = vmatprep.subr.bf16.mxu1 %v1303_v43 }
  0x5e   :  { %532 = vmatpush1.bf16.msra.mxu0 %v1304_v44 }
  0x5f   :  { %1145 = vmatpush3.bf16.msra.mxu1 %v1305_v45  ;;  %533 = vmatprep.subr.bf16.mxu0 %v1306_v46 }
  0x60   :  { %1146 = vmatprep.subr.bf16.mxu1 %v1308_v47  ;;  %v157_v47 = vshrl.u32 %v156_v41, 7 }
  0x62   :  { %534 = vmatpush1.bf16.msra.mxu0 %v1309_v48  ;;  %v162_v50 = vsub.s32 1, %v157_v47  ;;  %v166_v54 = vsub.s32 2, %v157_v47 }
  0x63   :  { %1147 = vmatpush3.bf16.msra.mxu1 %v1310_v49  ;;  %535 = vmatprep.subr.bf16.mxu0 %v1311_v52  ;;  %v158_v49 = vsub.s32 0, %v157_v47 }
  0x64   :  { %1148 = vmatprep.subr.bf16.mxu1 %v1313_v53  ;;  %v163_v53 = vrot.slane %v154_v51, %v162_v50 }
  0x65   :  { %v159_v52 = vrot.slane %v154_v51, %v158_v49 }
  0x66   :  { %536 = vmatpush1.bf16.msra.mxu0 %v1314_v55 }
  0x67   :  { %1149 = vmatpush3.bf16.msra.mxu1 %v1315_v56  ;;  %537 = vmatprep.subr.bf16.mxu0 %v1316_v57 }
  0x68   :  { %1150 = vmatprep.subr.bf16.mxu1 %v1318_v58 }
  0x6a   :  { %538 = vmatpush1.bf16.msra.mxu0 %v1319_v59 }
  0x6b   :  { %1151 = vmatpush3.bf16.msra.mxu1 %v1320_v60  ;;  %539 = vmatprep.subr.bf16.mxu0 %v1321_v63  ;;  %v167_v63 = vrot.slane %v154_v51, %v166_v54 }
  0x6c   :  { %1195 = vmatprep.subr.bf16.mxu1 %v1475_v4 }
  0x6e   :  { %632 = vmatmul.mubr.bf16.vlgmr.msra.gmra.mrb[4].mxu1 %v69_v2  ;;  %540 = vmatpush1.bf16.msra.mxu0 %v1323_v0 }
  0x6f   :  { %1196 = vmatpush3.bf16.msra.mxu1 %v1324_v1  ;;  %541 = vmatprep.subr.bf16.mxu0 %v1325_v3 }
  0x70   :  { %1197 = vmatprep.subr.bf16.mxu1 %v1475_v4  ;;  %1205 = vmatprep.mubr.msk.bf16.mxu1 %vm1476_vm2, %v1475_v4 }
  0x72   :  { %542 = vmatpush1.bf16.msra.mxu0 %v1327_v5 }
  0x73   :  { %1198 = vmatpush3.bf16.msra.mxu1 %v1328_v6  ;;  %543 = vmatprep.subr.bf16.mxu0 %v1329_v7 }
  0x74   :  { %1199 = vmatprep.subr.bf16.mxu1 %v1475_v4 }
  0x76   :  { %544 = vmatpush1.bf16.msra.mxu0 %v1331_v8 }
  0x77   :  { %1200 = vmatpush3.bf16.msra.mxu1 %v1332_v9  ;;  %1209 = vmatprep.subr.bf16.mxu0 %v1475_v4 }
  0x78   :  { %1201 = vmatprep.subr.bf16.mxu1 %v1475_v4 }
  0x79   :  { %546 = vmatmul.mubr.bf16.vlgmr.msra.gmra.mrb[0].mxu0 %v69_v2 }
  0x7a   :  { %1225 = vmatprep.mubr.msk.bf16.mxu0 %vm1476_vm2, %v1475_v4  ;;  %1210 = vmatpush3.bf16.msra.mxu0 %v1339_v17 }
  0x7b   :  { %1202 = vmatpush3.bf16.msra.mxu1 %v1333_v10  ;;  %1211 = vmatprep.subr.bf16.mxu0 %v1475_v4 }
  0x7c   :  { %1203 = vmatprep.subr.bf16.mxu1 %v1475_v4 }
  0x7e   :  { %1212 = vmatpush3.bf16.msra.mxu0 %v1342_v20 }
  0x7f   :  { %1204 = vmatpush3.bf16.msra.mxu1 %v511_v12  ;;  %1213 = vmatprep.subr.bf16.mxu0 %v1475_v4 }
  0x80   :  { %1164 = vmatprep.subr.bf16.mxu1 %v1335_v13 }
  0x82   :  { %1206 = vmatmul.mubr.msk.bf16.vlgmr.msra.gmra.mrb[8].mxu1 %vm499_vm1, %v1548_v27  ;;  %1214 = vmatpush3.bf16.msra.mxu0 %v1345_v23  ;;  %v1349_v27 = vld [vmem:[#allocation7 + $0x68] sm:$0xff]  }
  0x83   :  { %1165 = vmatpush3.bf16.msra.mxu1 %v1336_v14  ;;  %1215 = vmatprep.subr.bf16.mxu0 %v1475_v4 }
  0x84   :  { %1166 = vmatprep.subr.bf16.mxu1 %v1337_v15 }
  0x86   :  { %1216 = vmatpush3.bf16.msra.mxu0 %v1348_v26 }
  0x87   :  { %1167 = vmatpush3.bf16.msra.mxu1 %v1338_v16  ;;  %1217 = vmatprep.subr.bf16.mxu0 %v1475_v4 }
  0x88   :  { %1168 = vmatprep.subr.bf16.mxu1 %v1340_v18 }
  0x8a   :  { %1218 = vmatpush3.bf16.msra.mxu0 %v1351_v29 }
  0x8b   :  { %1169 = vmatpush3.bf16.msra.mxu1 %v1341_v19  ;;  %1219 = vmatprep.subr.bf16.mxu0 %v1475_v4 }
  0x8c   :  { %1170 = vmatprep.subr.bf16.mxu1 %v1343_v21 }
  0x8e   :  { %1220 = vmatpush3.bf16.msra.mxu0 %v1354_v32 }
  0x8f   :  { %1171 = vmatpush3.bf16.msra.mxu1 %v1344_v22  ;;  %1221 = vmatprep.subr.bf16.mxu0 %v1475_v4 }
  0x90   :  { %1172 = vmatprep.subr.bf16.mxu1 %v1346_v24 }
  0x92   :  { %1222 = vmatpush3.bf16.msra.mxu0 %v1357_v35 }
  0x93   :  { %1173 = vmatpush3.bf16.msra.mxu1 %v1347_v25  ;;  %1223 = vmatprep.subr.bf16.mxu0 %v1475_v4 }
  0x94   :  { %1174 = vmatprep.subr.bf16.mxu1 %v1349_v27 }
  0x96   :  { %1224 = vmatpush3.bf16.msra.mxu0 %v1358_v36 }
  0x97   :  { %1175 = vmatpush3.bf16.msra.mxu1 %v1350_v28 }
  0x98   :  { %1176 = vmatprep.subr.bf16.mxu1 %v1352_v30 }
  0x9b   :  { %1177 = vmatpush3.bf16.msra.mxu1 %v1353_v31 }
  0x9c   :  { %1178 = vmatprep.subr.bf16.mxu1 %v1355_v33 }
  0x9f   :  { %1179 = vmatpush3.bf16.msra.mxu1 %v1356_v34 }
 0x121   :  { %v590_v37 = vpop.f32.mrb[0].mxu1 }
 0x122   :  { %v592_v38 = vpop.f32.mrb[1].mxu1 }
 0x123   :  { %v594_v39 = vpop.f32.mrb[2].mxu1 }
 0x124   :  { %v596_v40 = vpop.f32.mrb[3].mxu1 }
 0x141   :  { %v1152_v42 = vpop.f32.mrb[4].mxu1 }
 0x142   :  { %v1153_v43 = vpop.f32.mrb[5].mxu1 }
 0x143   :  { %v1154_v44 = vadd.f32 %v1153_v43, %v1152_v42  ;;  %v1155_v45 = vpop.f32.mrb[6].mxu1 }
 0x144   :  { %v1156_v46 = vpop.f32.mrb[7].mxu1 }
 0x145   :  { %v1157_v48 = vadd.f32 %v1156_v46, %v1155_v45  ;;  %v634_v8 = vadd.f32 %v1154_v44, %v167_v63 }
 0x147   :  { %v637_v18 = vadd.f32 %v1157_v48, %v167_v63 }
 0x14c   :  { %v547_v55 = vpop.f32.mrb[0].mxu0 }
 0x14d   :  { %v548_v56 = vadd.f32 %v547_v55, %v159_v52  ;;  %v549_v57 = vpop.f32.mrb[1].mxu0 }
 0x14e   :  { %v550_v58 = vadd.f32 %v549_v57, %v163_v53  ;;  %v551_v59 = vpop.f32.mrb[2].mxu0 }
 0x14f   :  { %v591_v60 = vadd.f32 %v590_v37, %v548_v56  ;;  %v552_v61 = vadd.f32 %v551_v59, %v159_v52  ;;  %v553_v62 = vpop.f32.mrb[3].mxu0 }
 0x150   :  { %v593_v0 = vadd.f32 %v592_v38, %v550_v58  ;;  %v554_v1 = vadd.f32 %v553_v62, %v163_v53 }
 0x151   :  { %v681_v2 = vmul.f32 %v591_v60, %v591_v60  ;;  %v595_v3 = vadd.f32 %v594_v39, %v552_v61  ;;  %v693_v48 = vmul.f32 0.5, %v591_v60 }
 0x152   :  { %v682_v4 = vmul.f32 %v593_v0, %v593_v0  ;;  %v597_v5 = vadd.f32 %v596_v40, %v554_v1  ;;  %v694_v51 = vmul.f32 0.5, %v593_v0 }
 0x153   :  { %v687_v6 = vmul.f32 %v681_v2, %v591_v60  ;;  %v684_v7 = vmul.f32 %v595_v3, %v595_v3  ;;  %v696_v49 = vmul.f32 0.5, %v595_v3 }
 0x154   :  { %v688_v9 = vmul.f32 %v682_v4, %v593_v0  ;;  %v685_v10 = vmul.f32 %v597_v5, %v597_v5  ;;  %v697_v52 = vmul.f32 0.5, %v597_v5 }
 0x155   :  { %v674_v11 = vpop.f32.mrb[8].mxu1  ;;  %v699_v12 = vmul.f32 0.044715, %v687_v6  ;;  %v690_v13 = vmul.f32 %v684_v7, %v595_v3  ;;  %v1111_v7 = vld [vmem:[%s1592_s4] ss:$0 sm:$0xff]  ;;  %s1437_s4 = scalar_lea.vmem %s1033_s11, 256 }
 0x156   :  { %v675_v14 = vadd.f32 %v674_v11, %v634_v8  ;;  %v1207_v15 = vpop.f32.mrb[9].mxu1  ;;  %v700_v16 = vmul.f32 0.044715, %v688_v9  ;;  %v691_v17 = vmul.f32 %v685_v10, %v597_v5  ;;  %p1438_p10 = scmp.ne.s32.totalorder %s1033_s11, %s1437_s4  ;;  %p1443_p12 = scmp.lt.s32.totalorder %s1437_s4, %s1437_s4 }
 0x157   :  { %v677_v19 = vpop.f32.mrb[10].mxu1  ;;  %v705_v20 = vadd.f32 %v699_v12, %v591_v60  ;;  %v702_v21 = vmul.f32 0.044715, %v690_v13 }
 0x158   :  { %v683_v22 = vmul.f32 %v675_v14, %v675_v14  ;;  %v1208_v23 = vpop.f32.mrb[11].mxu1  ;;  %v706_v24 = vadd.f32 %v700_v16, %v593_v0  ;;  %v703_v25 = vmul.f32 0.044715, %v691_v17  ;;  %v678_v26 = vadd.f32 %v677_v19, %v637_v18  ;;  %p1444_p13 = por %p1443_p12, %p1442_p11 }
 0x159   :  { %v711_v27 = vmul.f32 0.7978846, %v705_v20  ;;  %v708_v28 = vadd.f32 %v702_v21, %v595_v3  ;;  %v695_v1 = vmul.f32 0.5, %v675_v14 }
 0x15a   :  { %v689_v29 = vmul.f32 %v683_v22, %v675_v14  ;;  %v712_v30 = vmul.f32 0.7978846, %v706_v24  ;;  %v709_v31 = vadd.f32 %v703_v25, %v597_v5  ;;  %v686_v32 = vmul.f32 %v678_v26, %v678_v26  ;;  %p1445_p0 = pnand %p1444_p13, %p1438_p10 }
 0x15b   :  { %1359 = vtanh.f32 %v711_v27  ;;  %v714_v33 = vmul.f32 0.7978846, %v708_v28  ;;  %v698_v2 = vmul.f32 0.5, %v678_v26 }
 0x15c   :  { %v701_v34 = vmul.f32 0.044715, %v689_v29  ;;  %v715_v35 = vmul.f32 0.7978846, %v709_v31  ;;  %v692_v36 = vmul.f32 %v686_v32, %v678_v26  ;;  %1361 = vtanh.f32 %v712_v30 }
 0x15d   :  { %1363 = vtanh.f32 %v714_v33 }
 0x15e   :  { %v707_v37 = vadd.f32 %v701_v34, %v675_v14  ;;  %v704_v38 = vmul.f32 0.044715, %v692_v36  ;;  %1365 = vtanh.f32 %v715_v35 }
 0x160   :  { %v713_v39 = vmul.f32 0.7978846, %v707_v37  ;;  %v710_v40 = vadd.f32 %v704_v38, %v678_v26 }
 0x162   :  { %1367 = vtanh.f32 %v713_v39  ;;  %v716_v41 = vmul.f32 0.7978846, %v710_v40 }
 0x164   :  { %1369 = vtanh.f32 %v716_v41 }
 0x165   :  { %v1360_v42 = vpop.eup %1359 }
 0x166   :  { %v1362_v43 = vpop.eup %1361  ;;  %v723_v44 = vadd.f32 1.0, %v1360_v42 }
 0x167   :  { %v1364_v45 = vpop.eup %1363  ;;  %v724_v46 = vadd.f32 1.0, %v1362_v43 }
 0x168   :  { %v1366_v47 = vpop.eup %1365  ;;  %v726_v50 = vadd.f32 1.0, %v1364_v45  ;;  %v729_v54 = vmul.f32 %v723_v44, %v693_v48 }
 0x169   :  { %v727_v53 = vadd.f32 1.0, %v1366_v47  ;;  %v730_v57 = vmul.f32 %v724_v46, %v694_v51 }
 0x16a   :  { %v732_v55 = vmul.f32 %v726_v50, %v696_v49 }
 0x16b   :  { %v733_v58 = vmul.f32 %v727_v53, %v697_v52 }
 0x16c   :  { %v1368_v56 = vpop.eup %1367  ;;  %v735_v59 = vpack.c.bf16 %v732_v55, %v729_v54 }
 0x16d   :  { %v736_v61 = vpack.c.bf16 %v733_v58, %v730_v57  ;;  %v725_v62 = vadd.f32 1.0, %v1368_v56 }
 0x16e   :  { %v1370_v63 = vpop.eup %1369 }
 0x16f   :  { %969 = vmatprep.mubr.bf16.mxu1 %v736_v61  ;;  %v728_v4 = vadd.f32 1.0, %v1370_v63  ;;  %v731_v60 = vmul.f32 %v725_v62, %v695_v1 }
 0x170   :  { %970 = vmatmul.mubr.bf16.vlgmr.msra.gmra.mrb[12].mxu1 %v735_v59 }
 0x171   :  { %v734_v3 = vmul.f32 %v728_v4, %v698_v2 }
 0x173   :  { %v737_v6 = vpack.c.bf16 %v734_v3, %v731_v60 }
 0x175   :  { %1226 = vmatmul.mubr.bf16.vlgmr.msra.gmra.mrb[4].mxu0 %v737_v6 }
 0x243   :  { %v1180_v0 = vpop.f32.mrb[12].mxu1 }
 0x244   :  { %v1181_v5 = vpop.f32.mrb[13].mxu1 }
 0x245   :  { %v1182_v8 = vadd.f32 %v1181_v5, %v1180_v0  ;;  %v1183_v9 = vpop.f32.mrb[14].mxu1 }
 0x246   :  { %v1184_v10 = vpop.f32.mrb[15].mxu1 }
 0x247   :  { %v1185_v11 = vadd.f32 %v1184_v10, %v1183_v9  ;;  %v972_v12 = vadd.f32 %v1182_v8, %v1111_v7 }
 0x248   :  { %v1012_v13 = vpop.f32.mrb[4].mxu0 }
 0x249   :  { %v1013_v14 = vadd.f32 %v1012_v13, %v972_v12  ;;  %v1227_v15 = vpop.f32.mrb[5].mxu0  ;;  %v975_v16 = vadd.f32 %v1185_v11, %v1111_v7 }
 0x24a   :  { %v1015_v17 = vpop.f32.mrb[6].mxu0 }
 0x24b   :  { %vm1019_vm3 = vcmp.ge.f32.partialorder %v1013_v14, 0.0  ;;  %v1021_v18 = vmul.f32 0.01, %v1013_v14  ;;  %v1016_v19 = vadd.f32 %v1015_v17, %v975_v16  ;;  %v1228_v20 = vpop.f32.mrb[7].mxu0 }
 0x24d   :  { %v1023_v21 = vsel %vm1019_vm3, %v1013_v14, %v1021_v18  ;;  %vm1020_vm4 = vcmp.ge.f32.partialorder %v1016_v19, 0.0  ;;  %v1022_v22 = vmul.f32 0.01, %v1016_v19 }
 0x24e   :  { %1025 = vst [vmem:[#allocation8] sm:$0xff] %v1023_v21 }
 0x24f   :  { %v1024_v23 = vsel %vm1020_vm4, %v1016_v19, %v1022_v22 }
 0x250   :  { %1026 = vst [vmem:[#allocation8 + $0x8] sm:$0xff] %v1024_v23 }
 0x251   :  { %1448 = shalt.err (!%p1445_p0)
}
 0x252   :  { %s1449_s14 = scalar_lea.hbm %s1593_s5, 256 }
 0x253   :  { %p1450_p1 = scmp.ne.s32.totalorder %s1593_s5, %s1449_s14  ;;  %p1453_p2 = scmp.lt.u32.totalorder %s1449_s14, %s1593_s5 }
 0x255   :  { %p1455_p3 = pnand %p1453_p2, %p1450_p1 }
 0x257   :  { %1458 = shalt.err (!%p1455_p3)
}
 0x258   :  { %s1478_s18 = smov 128   ;;  %s1479_s19 = smov 8  }
 0x259   :  { %1038 = dma.vmem_to_hbm [thread:$0]  %s1033_s11, 256, %s1593_s5, [#allocation4], %s1478_s18, %s1478_s18, %s1479_s19  }
 0x25a   :  { %1463 = dma.done.wait [#allocation4], 256  }
 0x25b   :  { %1464 = vsyncadd [#allocation4], 4294967040 }
 0x25c   :  { %1042 = vsyncpa [#allocation3], 1 }
 0x25d   :  { %1043 = vsyncpa [#allocation6], 1 }
 0x25e   :  { %1044 = vsyncpa [#allocation4], 1 }

</bundles_post_ra>
